<compile_context>
chip_gen: v7x
topology: tpu7x:2x2x1
jax: 0.10.0
libtpu: 0.0.40
codegen_flags: <defaults>
</compile_context>

<pallas_src>
import jax
import jax.numpy as jnp
from jax import lax
from jax.experimental import pallas as pl
from jax.experimental.pallas import tpu as pltpu

NUM_VARS = 8                    # codewords per group
GROUPS   = 8                    # quantizer groups (combine_groups=False chosen)
VAR_DIM  = 64                   # vq_dim // groups = (groups*64)//groups
HID      = 32                   # quantizer input dim ("dim=32")
CODE     = GROUPS * NUM_VARS    # 64 logits per row


def _round_up(a, b):
    return (a + b - 1) // b * b


def quant_layer_kernel(x_ref, w1t_ref, b1_ref, w2_ref, bpost_ref, out_ref):
    f32 = jnp.float32
    x = x_ref[...].astype(f32)                                        # (tm, in_dim) natural layout

    # fused quantizer_preproject . weight_proj; contract x's feature dim in place
    # (no wrapper transpose).  logits_t[c, r] = sum_k w1t[c, k] * x[r, k]  -> (64, tm):
    # code index on sublanes, rows on lanes.
    logits_t = lax.dot_general(
        w1t_ref[...], x, (((1,), (1,)), ((), ())), preferred_element_type=f32
    ) + b1_ref[...]

    # grouped eval-mode hard argmax -> one-hot.  Per-group max / first-index reductions are
    # plain sublane reduces over full-lane vregs (rows on lanes).
    tm_cur = logits_t.shape[-1]
    l3 = logits_t.reshape(GROUPS, NUM_VARS, tm_cur)                   # free leading split
    mx = jnp.max(l3, axis=1, keepdims=True)                           # (G, 1, tm)
    iota = lax.broadcasted_iota(jnp.int32, l3.shape, 1).astype(f32)
    # first-occurrence argmax (matches torch.argmax tie-break)
    idx = jnp.min(jnp.where(l3 == mx, iota, float(NUM_VARS)), axis=1, keepdims=True)
    onehot_t = (iota == idx).astype(f32).reshape(CODE, tm_cur)        # (64, tm)

    # fused codebook gather . quantizer_postproject, emitted directly in natural
    # (tm, out_dim) orientation: contracting onehot_t's dim 0 is the in-kernel transpose of
    # the small one-hot (XLU slot is idle in this mem-bound kernel).
    out = lax.dot_general(
        onehot_t, w2_ref[...], (((0,), (0,)), ((), ())), preferred_element_type=f32
    ) + bpost_ref[...]
    out_ref[...] = out.astype(out_ref.dtype)


def make_params(key, in_dim, out_dim):
    ks = jax.random.split(key, 6)
    return dict(
        # quantizer_preproject = nn.Linear(in_dim, 32)
        wpre=jax.random.normal(ks[0], (HID, in_dim), jnp.float32) * 0.05,
        bpre=jax.random.normal(ks[1], (HID,), jnp.float32) * 0.01,
        # quantizer.weight_proj = nn.Linear(32, groups*num_vars); fairseq init: N(0,1) weight, zero bias
        wproj=jax.random.normal(ks[2], (GROUPS * NUM_VARS, HID), jnp.float32),
        bproj=jnp.zeros((GROUPS * NUM_VARS,), jnp.float32),
        # quantizer.vars: (1, groups*num_vars, var_dim), uniform init
        vars=jax.random.uniform(ks[3], (1, GROUPS * NUM_VARS, VAR_DIM), jnp.float32),
        # quantizer_postproject = nn.Linear(groups*64, out_dim)
        wpost=jax.random.normal(ks[4], (out_dim, GROUPS * VAR_DIM), jnp.float32) * 0.05,
        bpost=jax.random.normal(ks[5], (out_dim,), jnp.float32) * 0.01,
    )


def quant_layer_forward(x, p, *, tm=4096, min_grid_steps=4):
    B, T, in_dim = x.shape
    out_dim = p["wpost"].shape[0]
    n = B * T

    # ---- one-time parameter folding (plain-JAX glue) ----
    # logits = x @ (Wpre^T Wproj^T) + (bpre Wproj^T + bproj)
    w1t = p["wproj"] @ p["wpre"]                                      # (64, in_dim)
    b1 = (p["wproj"] @ p["bpre"] + p["bproj"]).reshape(CODE, 1)       # (64, 1)
    # onehot @ vars @ Wpost^T == onehot @ W2
    cvars = p["vars"][0].reshape(GROUPS, NUM_VARS, VAR_DIM)           # (G, V, 64)
    wpost3 = p["wpost"].reshape(out_dim, GROUPS, VAR_DIM)             # (out, G, 64)
    w2 = jnp.einsum("gvd,ogd->gvo", cvars, wpost3).reshape(CODE, out_dim)   # (64, out)
    bpost = p["bpost"].reshape(1, out_dim)                            # (1, out)

    # ---- natural-layout row tiling: no wrapper transpose, no pad-to-full-tile copy ----
    xf = x.reshape(n, in_dim)
    # Big tiles amortize the ~0.35 us/grid-step overhead; keep >= min_grid_steps steps when n
    # allows it so v7x's two TensorCores both get work and the pipeline can double-buffer.
    tm_eff = min(tm, max(8, _round_up(pl.cdiv(n, min_grid_steps), 8)))
    grid = (pl.cdiv(n, tm_eff),)

    def full_spec(a):
        nd = a.ndim
        return pl.BlockSpec(a.shape, lambda i, _nd=nd: (0,) * _nd)

    out = pl.pallas_call(
        quant_layer_kernel,
        out_shape=jax.ShapeDtypeStruct((n, out_dim), x.dtype),
        grid_spec=pltpu.PrefetchScalarGridSpec(
            num_scalar_prefetch=0,
            grid=grid,
            in_specs=[
                pl.BlockSpec((tm_eff, in_dim), lambda i: (i, 0)),
                full_spec(w1t), full_spec(b1),
                full_spec(w2), full_spec(bpost),
            ],
            out_specs=pl.BlockSpec((tm_eff, out_dim), lambda i: (i, 0)),
        ),
        compiler_params=pltpu.CompilerParams(dimension_semantics=("parallel",)),
    )(xf, w1t, b1, w2, bpost)

    return out.reshape(B, T, out_dim)


def ref_forward(x, p):
    """Pure-JAX reference mirroring the PyTorch eval-mode forward."""
    B, T, in_dim = x.shape
    xf = x.reshape(-1, in_dim)
    h = xf @ p["wpre"].T + p["bpre"]
    logits = h @ p["wproj"].T + p["bproj"]
    l3 = logits.reshape(-1, GROUPS, NUM_VARS)
    onehot = jax.nn.one_hot(jnp.argmax(l3, axis=-1), NUM_VARS, dtype=jnp.float32)
    cvars = p["vars"][0].reshape(GROUPS, NUM_VARS, VAR_DIM)
    q = jnp.einsum("ngv,gvd->ngd", onehot, cvars).reshape(-1, GROUPS * VAR_DIM)
    out = q @ p["wpost"].T + p["bpost"]
    return out.reshape(B, T, -1)


if __name__ == "__main__":
    B, T, IN_DIM, OUT_DIM = 2, 8, 48, 40

    key = jax.random.PRNGKey(0)
    kx, kp = jax.random.split(key)
    x = jax.random.normal(kx, (B, T, IN_DIM), jnp.float32)
    params = make_params(kp, IN_DIM, OUT_DIM)

    out = quant_layer_forward(x, params)
    out = jax.block_until_ready(out)

    ref = ref_forward(x, params)
    assert out.shape == (B, T, OUT_DIM)
    assert jnp.allclose(out, ref, rtol=1e-4, atol=1e-4), "mismatch vs reference"

    print("KERNEL_OK")
</pallas_src>

<mosaic_0001>
module attributes {stable_mosaic.version = 11 : i64} {
  func.func @quant_layer_kernel(%arg0: i32, %arg1: memref<8x48xf32, #tpu.memory_space<vmem>>, %arg2: memref<64x48xf32, #tpu.memory_space<vmem>>, %arg3: memref<64x1xf32, #tpu.memory_space<vmem>>, %arg4: memref<64x40xf32, #tpu.memory_space<vmem>>, %arg5: memref<1x40xf32, #tpu.memory_space<vmem>>, %arg6: memref<8x40xf32, #tpu.memory_space<vmem>>) attributes {dimension_semantics = [#tpu.dimension_semantics<parallel>], iteration_bounds = array<i64: 2>, scalar_prefetch = 0 : i64, scratch_operands = 0 : i64, tpu.core_type = #tpu.core_type<tc>, window_params = [{transform_indices = @transform_0, window_bounds = array<i64: 8, 48>}, {pipeline_mode = #tpu.pipeline_mode<synchronous>, transform_indices = @transform_1, window_bounds = array<i64: 64, 48>}, {pipeline_mode = #tpu.pipeline_mode<synchronous>, transform_indices = @transform_2, window_bounds = array<i64: 64, 1>}, {pipeline_mode = #tpu.pipeline_mode<synchronous>, transform_indices = @transform_3, window_bounds = array<i64: 64, 40>}, {pipeline_mode = #tpu.pipeline_mode<synchronous>, transform_indices = @transform_4, window_bounds = array<i64: 1, 40>}, {transform_indices = @transform_5, window_bounds = array<i64: 8, 40>}]} {
    %c0 = arith.constant 0 : index
    %c0_0 = arith.constant 0 : index
    %0 = vector.load %arg1[%c0, %c0_0] : memref<8x48xf32, #tpu.memory_space<vmem>>, vector<8x48xf32>
    %c0_1 = arith.constant 0 : index
    %c0_2 = arith.constant 0 : index
    %1 = vector.load %arg2[%c0_1, %c0_2] : memref<64x48xf32, #tpu.memory_space<vmem>>, vector<64x48xf32>
    %cst = arith.constant dense<0.000000e+00> : vector<64x8xf32>
    %2 = tpu.matmul %1, %0, %cst {dimension_numbers = #tpu.dot_dimension_numbers<[1], [1], [0], [0], [0, 0, 1, 0], [], []>} : vector<64x48xf32>, vector<8x48xf32>, vector<64x8xf32> -> vector<64x8xf32>
    %c0_3 = arith.constant 0 : index
    %c0_4 = arith.constant 0 : index
    %3 = vector.load %arg3[%c0_3, %c0_4] : memref<64x1xf32, #tpu.memory_space<vmem>>, vector<64x1xf32>
    %4 = vector.broadcast %3 : vector<64x1xf32> to vector<64x8xf32>
    %5 = arith.addf %2, %4 : vector<64x8xf32>
    %6 = vector.shape_cast %5 : vector<64x8xf32> to vector<8x8x8xf32>
    %cst_5 = arith.constant dense<0xFF800000> : vector<8x8xf32>
    %7 = vector.multi_reduction <maximumf>, %6, %cst_5 [1] : vector<8x8x8xf32> to vector<8x8xf32>
    %8 = vector.shape_cast %7 : vector<8x8xf32> to vector<8x1x8xf32>
    %9 = tpu.iota {dimensions = array<i32: 1>} : vector<8x8x8xi32>
    %10 = arith.sitofp %9 : vector<8x8x8xi32> to vector<8x8x8xf32>
    %11 = vector.broadcast %8 : vector<8x1x8xf32> to vector<8x8x8xf32>
    %12 = arith.cmpf oeq, %6, %11 : vector<8x8x8xf32>
    %cst_6 = arith.constant 8.000000e+00 : f32
    %13 = vector.broadcast %cst_6 : f32 to vector<8x8x8xf32>
    %14 = arith.select %12, %10, %13 : vector<8x8x8xi1>, vector<8x8x8xf32>
    %cst_7 = arith.constant dense<0x7F800000> : vector<8x8xf32>
    %15 = vector.multi_reduction <minimumf>, %14, %cst_7 [1] : vector<8x8x8xf32> to vector<8x8xf32>
    %16 = vector.shape_cast %15 : vector<8x8xf32> to vector<8x1x8xf32>
    %17 = vector.broadcast %16 : vector<8x1x8xf32> to vector<8x8x8xf32>
    %18 = arith.cmpf oeq, %10, %17 : vector<8x8x8xf32>
    %19 = arith.extui %18 : vector<8x8x8xi1> to vector<8x8x8xi32>
    %20 = arith.sitofp %19 : vector<8x8x8xi32> to vector<8x8x8xf32>
    %21 = vector.shape_cast %20 : vector<8x8x8xf32> to vector<64x8xf32>
    %c0_8 = arith.constant 0 : index
    %c0_9 = arith.constant 0 : index
    %22 = vector.load %arg4[%c0_8, %c0_9] : memref<64x40xf32, #tpu.memory_space<vmem>>, vector<64x40xf32>
    %cst_10 = arith.constant dense<0.000000e+00> : vector<8x40xf32>
    %23 = tpu.matmul %21, %22, %cst_10 {dimension_numbers = #tpu.dot_dimension_numbers<[0], [0], [1], [1], [0, 1, 1, 1], [], []>} : vector<64x8xf32>, vector<64x40xf32>, vector<8x40xf32> -> vector<8x40xf32>
    %c0_11 = arith.constant 0 : index
    %c0_12 = arith.constant 0 : index
    %24 = vector.load %arg5[%c0_11, %c0_12] : memref<1x40xf32, #tpu.memory_space<vmem>>, vector<1x40xf32>
    %25 = vector.broadcast %24 : vector<1x40xf32> to vector<8x40xf32>
    %26 = arith.addf %23, %25 : vector<8x40xf32>
    %c0_13 = arith.constant 0 : index
    %c0_14 = arith.constant 0 : index
    %27 = vector.load %arg6[%c0_13, %c0_14] : memref<8x40xf32, #tpu.memory_space<vmem>>, vector<8x40xf32>
    tpu.vector_store %arg6[%c0_13, %c0_14], %26 {strides = array<i32>} : memref<8x40xf32, #tpu.memory_space<vmem>>, vector<8x40xf32>,
    return
  }
  func.func @transform_0(%arg0: i32) -> (i32, i32) {
    %c0_i32 = arith.constant 0 : i32
    %c0_i32_0 = arith.constant 0 : i32
    return %arg0, %c0_i32 : i32, i32
  }
  func.func @transform_1(%arg0: i32) -> (i32, i32) {
    %c0_i32 = arith.constant 0 : i32
    %c0_i32_0 = arith.constant 0 : i32
    %c0_i32_1 = arith.constant 0 : i32
    return %c0_i32, %c0_i32_0 : i32, i32
  }
  func.func @transform_2(%arg0: i32) -> (i32, i32) {
    %c0_i32 = arith.constant 0 : i32
    %c0_i32_0 = arith.constant 0 : i32
    %c0_i32_1 = arith.constant 0 : i32
    return %c0_i32, %c0_i32_0 : i32, i32
  }
  func.func @transform_3(%arg0: i32) -> (i32, i32) {
    %c0_i32 = arith.constant 0 : i32
    %c0_i32_0 = arith.constant 0 : i32
    %c0_i32_1 = arith.constant 0 : i32
    return %c0_i32, %c0_i32_0 : i32, i32
  }
  func.func @transform_4(%arg0: i32) -> (i32, i32) {
    %c0_i32 = arith.constant 0 : i32
    %c0_i32_0 = arith.constant 0 : i32
    %c0_i32_1 = arith.constant 0 : i32
    return %c0_i32, %c0_i32_0 : i32, i32
  }
  func.func @transform_5(%arg0: i32) -> (i32, i32) {
    %c0_i32 = arith.constant 0 : i32
    %c0_i32_0 = arith.constant 0 : i32
    return %arg0, %c0_i32 : i32, i32
  }
}

</mosaic_0001>

<bundles_post_ra>
// kernel: tpu_custom_call.1
= control target key start
LH: loop header
LB: loop body
LE: loop exit
PB: predicated region body
PF: predicated region fallthrough
CT: control target
= control target key end

     0   :  { %10 = vsyncpa [#allocation3], 0  ;;  %s1250_s0 = inlined_call_operand.vmem [shape: f32[16,48], index: 0, kind: input, shape index: {}]   ;;  %s1251_s1 = inlined_call_operand.vmem [shape: f32[64,48], index: 1, kind: input, shape index: {}]   ;;  %s1252_s2 = inlined_call_operand.vmem [shape: f32[64,1], index: 2, kind: input, shape index: {}]   ;;  %s1253_s3 = inlined_call_operand.vmem [shape: f32[64,40], index: 3, kind: input, shape index: {}]   ;;  %s1254_s4 = inlined_call_operand.vmem [shape: f32[1,40], index: 4, kind: input, shape index: {}]   ;;  %s1255_s5 = inlined_call_operand.hbm [shape: f32[16,40], index: 5, kind: output, shape index: {}]  }
   0x1   :  { %12 = vsyncpa [#allocation3 + $0x1], 0  ;;  %s998_s18 = smov 0   ;;  %s1000_s19 = smov 0  }
   0x2   :  { %s1002_s20 = smov 0   ;;  %s1004_s21 = smov 0  }
   0x3 LB: > { %s1019_s22 = sadd.s32 4294967295, %s961_s21   ;;  %s762_s23 = sadd.s32 4294967294, %s961_s21   ;;  %s961_s21 = sphi %s1004_s21, %s1261_s21   ;;  %s957_s20 = sphi %s1002_s20, %s1260_s20   ;;  %s953_s19 = sphi %s1000_s19, %s1259_s19   ;;  %s949_s18 = sphi %s998_s18, %s1258_s18  }
   0x4   : > { %s1023_s24 = sadd.s32 1, %s961_s21   ;;  %s135_s25 = sadd.s32 1, %s957_s20 }
   0x5   : > { %s132_s26 = ssub.s32 %s961_s21, %s1023_s24  ;;  %p145_p0 = scmp.ne.s32.totalorder %s957_s20, %s953_s19 }
   0x6   : > { %p133_p1 = scmp.eq.s32.totalorder %s132_s26, 0  ;;  %p146_p2 = scmp.eq.s32.totalorder %s1019_s22, 1 }
   0x7   : > { %p151_p3 = scmp.ne.s32.totalorder %s953_s19, %s949_s18  ;;  %p152_p4 = scmp.eq.s32.totalorder %s762_s23, 1 }
   0x8   : > { %s1034_s27 = scalar_select %p133_p1, %s957_s20, %s135_s25  }
   0x9   : > { %p1036_p5 = por %p146_p2, %p145_p0  ;;  %p1040_p6 = por %p152_p4, %p151_p3 }
   0xa   : > { %p765_p7 = scmp.ge.s32.totalorder %s961_s21, 1  ;;  %p189_p8 = scmp.lt.s32.totalorder %s961_s21, 3 }
   0xc   : > { %p190_p9 = pnand %p765_p7, %p189_p8 }
   0xd   : > { %p216_p10 = scmp.lt.s32.totalorder (!%p190_p9), %s1019_s22, 1  ;;  %vm277_vm0 = vcmask (!%p190_p9), 392192   ;;  %v221_v0 = vld [vmem:[%s1251_s1] sm:$0xff] (!%p190_p9)  ;;  %v963_v1 = vmov (!%p190_p9), 0   ;;  %v231_v3 = vld [vmem:[%s1252_s2 + $0x10] sm:$0xff] (!%p190_p9)  ;;  %v230_v4 = vld [vmem:[%s1252_s2 + $0x8] sm:$0xff] (!%p190_p9)  ;;  %v467_v41 = vlaneseq (!%p190_p9) }
   0xe   : > { %193 = sbr.rel (%p190_p9) target bundleno = 635 (0x27b), region = 40  ;;  %811 = vmatprep.mubr.msk.f32.mxu0 (!%p190_p9), %vm277_vm0, %v221_v0  ;;  %897 = vset.pattern.permute.xlu0 (!%p190_p9), %v963_v1  ;;  %v229_v2 = vld [vmem:[%s1252_s2] sm:$0xff] (!%p190_p9)  ;;  %v232_v5 = vld [vmem:[%s1252_s2 + $0x18] sm:$0xff] (!%p190_p9)  ;;  %v222_v7 = vld [vmem:[%s1251_s1 + $0x8] sm:$0xff] (!%p190_p9)  ;;  %v964_v21 = vmov (!%p190_p9), 0.0|0.0   ;;  %vm965_vm1 = vmmov (!%p190_p9), 0  }
   0xf   : > { %898 = vset.pattern.permute.xlu1 (!%p190_p9), %v963_v1  ;;  %239 = vperm.xlu0 (!%p190_p9), %897, %v229_v2   ;;  %v233_v8 = vld [vmem:[%s1252_s2 + $0x20] sm:$0xff] (!%p190_p9)  ;;  %v223_v9 = vld [vmem:[%s1251_s1 + $0x10] sm:$0xff] (!%p190_p9)  ;;  %v234_v10 = vld [vmem:[%s1252_s2 + $0x28] sm:$0xff] (!%p190_p9)  ;;  %v966_v24 = vmov (!%p190_p9), 0.0   ;;  %vm410_vm2 = vcmask (!%p190_p9), 64512   ;;  %v468_v52 = vshrl.u32 (!%p190_p9), %v467_v41, 7 }
  0x10   : > { %249 = vperm.xlu1 (!%p190_p9), %898, %v231_v3   ;;  %v224_v11 = vld [vmem:[%s1251_s1 + $0x18] sm:$0xff] (!%p190_p9)  ;;  %v235_v12 = vld [vmem:[%s1252_s2 + $0x30] sm:$0xff] (!%p190_p9)  ;;  %v225_v13 = vld [vmem:[%s1251_s1 + $0x20] sm:$0xff] (!%p190_p9)  ;;  %842 = vmatprep.subr.bf16.mxu1 (!%p190_p9), %v964_v21  ;;  %s213_s10 = sand.u32 (!%p190_p9), 1, %s953_s19   ;;  %s788_s14 = sshll.u32 (!%p190_p9), %s1019_s22, 7 }
  0x11   : > { %v236_v14 = vld [vmem:[%s1252_s2 + $0x38] sm:$0xff] (!%p190_p9)  ;;  %v226_v15 = vld [vmem:[%s1251_s1 + $0x28] sm:$0xff] (!%p190_p9)  ;;  %v227_v16 = vld [vmem:[%s1251_s1 + $0x30] sm:$0xff] (!%p190_p9)  ;;  %839 = vmatprep.mubr.msk.f32.mxu1 (!%p190_p9), %vm965_vm1, %v966_v24  ;;  %v1148_v2 = vcvt.s32.f32 (!%p190_p9), %v468_v52  ;;  %s766_s11 = sshll.u32 (!%p190_p9), %s213_s10, 3  ;;  %s1208_s25 = scalar_lea.hbm (!%p190_p9), %s1255_s5, %s788_s14 }
  0x12   : > { %v228_v17 = vld [vmem:[%s1251_s1 + $0x38] sm:$0xff] (!%p190_p9)  ;;  %v566_v18 = vld [vmem:[%s1253_s3] sm:$0xff] (!%p190_p9)  ;;  %v567_v19 = vld [vmem:[%s1253_s3 + $0x8] sm:$0xff] (!%p190_p9)  ;;  %s215_s15 = scalar_lea.vmem (!%p190_p9), [#allocation2], %s766_s11  ;;  %s690_s26 = scalar_lea.sflag (!%p190_p9), [#allocation3], %s213_s10 }
  0x13   : > { %244 = vperm.xlu0 (!%p190_p9), %897, %v230_v4   ;;  %v568_v20 = vld [vmem:[%s1253_s3 + $0x10] sm:$0xff] (!%p190_p9)  ;;  %v843_v22 = vpack.c.bf16 (!%p190_p9), %v567_v19, %v566_v18  ;;  %v569_v23 = vld [vmem:[%s1253_s3 + $0x18] sm:$0xff] (!%p190_p9)  ;;  %v570_v26 = vld [vmem:[%s1253_s3 + $0x20] sm:$0xff] (!%p190_p9)  ;;  %s703_s16 = sshll.u32 (!%p190_p9), %s215_s15, 4  ;;  %s1210_s16 = int_to_ptr.vmem [resolvable:$true] %s703_s16 }
  0x14   : > { %254 = vperm.xlu1 (!%p190_p9), %898, %v232_v5   ;;  %v846_v25 = vpack.c.bf16 (!%p190_p9), %v569_v23, %v568_v20  ;;  %v571_v27 = vld [vmem:[%s1253_s3 + $0x28] sm:$0xff] (!%p190_p9)  ;;  %v572_v29 = vld [vmem:[%s1253_s3 + $0x30] sm:$0xff] (!%p190_p9)  ;;  %v573_v30 = vld [vmem:[%s1253_s3 + $0x38] sm:$0xff] (!%p190_p9)  ;;  %s899_s30 = scalar_lea.vmem (!%p190_p9), %s1210_s16, 128 }
  0x15   : > { %s217_s7 = scalar_select %p216_p10, %s1019_s22, 1  ;;  %844 = vmatpush3.bf16.msra.mxu1 %v843_v22  ;;  %v849_v28 = vpack.c.bf16 %v571_v27, %v570_v26  ;;  %v852_v31 = vpack.c.bf16 %v573_v30, %v572_v29 }
  0x16   : > { %845 = vmatprep.subr.bf16.mxu1 %v964_v21  ;;  %p900_p11 = scmp.ne.s32.totalorder %s1210_s16, %s899_s30  ;;  %s967_s22 = smov [#allocation2]  }
  0x17   : > { %s767_s12 = sshll.u32 %s217_s7, 3  ;;  %259 = vperm.xlu0 %897, %v233_v8   ;;  %s903_s6 = sshll.u32 %s967_s22, 4  ;;  %s904_s6 = int_to_ptr.vmem [resolvable:$false] %s903_s6 }
  0x18   : > { %s219_s17 = scalar_lea.vmem %s1250_s0, %s767_s12  ;;  %264 = vperm.xlu1 %898, %v234_v10   ;;  %p901_p12 = pnand %p900_p11, %p1036_p5 }
  0x19   : > { %v220_v6 = vld [vmem:[%s219_s17] sm:$0xff]  ;;  %847 = vmatpush3.bf16.msra.mxu1 %v846_v25  ;;  %s905_s7 = scalar_lea.vmem %s904_s6, 256  ;;  %p906_p0 = scmp.lt.s32.totalorder %s1210_s16, %s904_s6 }
  0x1a   : > { %809 = vmatprep.subr.msk.mxu0 %vm277_vm0, %v220_v6  ;;  %848 = vmatprep.subr.bf16.mxu1 %v964_v21  ;;  %p902_p13 = pneg %p901_p12  ;;  %p907_p1 = scmp.lt.s32.totalorder %s905_s7, %s899_s30 }
  0x1b   : > { %810 = vmatpush3.xpose.msk.msra.mxu0 %vm277_vm0, %v220_v6  ;;  %269 = vperm.xlu0 %897, %v235_v12  }
  0x1c   : > { %274 = vperm.xlu1 %898, %v236_v14   ;;  %p908_p2 = por %p907_p1, %p906_p0 }
  0x1d   : > { %850 = vmatpush3.bf16.msra.mxu1 %v849_v28 }
  0x1e   : > { %812 = vmatmul.mubr.msk.f32.vlgmr.msra.gmra.mrb[0].mxu0 %vm277_vm0, %v222_v7  ;;  %851 = vmatprep.subr.bf16.mxu1 %v964_v21  ;;  %p909_p3 = pnand %p908_p2, %p902_p13 }
  0x1f   : > { %814 = vmatprep.mubr.msk.f32.mxu0 %vm277_vm0, %v223_v9 }
  0x21   : > { %853 = vmatpush3.bf16.msra.mxu1 %v852_v31 }
  0x22   : > { %815 = vmatmul.mubr.msk.f32.gmra.mrb[2].mxu0 %vm277_vm0, %v224_v11 }
  0x23   : > { %817 = vmatprep.mubr.msk.f32.mxu0 %vm277_vm0, %v225_v13 }
  0x26   : > { %818 = vmatmul.mubr.msk.f32.gmra.mrb[4].mxu0 %vm277_vm0, %v226_v15 }
  0x27   : > { %820 = vmatprep.mubr.msk.f32.mxu0 %vm277_vm0, %v227_v16 }
  0x2a   : > { %821 = vmatmul.mubr.msk.f32.gmra.mrb[6].mxu0 %vm277_vm0, %v228_v17 }
  0x8e   : > { %v240_v32 = vpop.permute.xlu0 %239 }
  0x8f   : > { %v250_v33 = vpop.permute.xlu1 %249 }
  0x92   : > { %v245_v34 = vpop.permute.xlu0 %244 }
  0x93   : > { %v255_v36 = vpop.permute.xlu1 %254 }
  0x96   : > { %v260_v51 = vpop.permute.xlu0 %259 }
  0x97   : > { %v265_v49 = vpop.permute.xlu1 %264 }
  0x9a   : > { %v270_v12 = vpop.permute.xlu0 %269 }
  0x9b   : > { %v275_v9 = vpop.permute.xlu1 %274 }
  0xf1   : > { %v813_v35 = vpop.f32.mrb[0].mxu0 }
  0xf2   : > { %v377_v37 = vadd.f32 %v813_v35, %v245_v34  ;;  %v371_v38 = vpop.f32.mrb[1].mxu0 }
  0xf3   : > { %v372_v39 = vadd.f32 %v371_v38, %v240_v32 }
  0xf4   : > { %v418_v40 = vsel %vm410_vm2, %v377_v37, -inf }
  0xf5   : > { %v419_v42 = vrot.slane %v418_v40, 4  ;;  %v411_v43 = vsel %vm410_vm2, %v372_v39, -inf  ;;  %v816_v44 = vpop.f32.mrb[2].mxu0 }
  0xf6   : > { %v412_v45 = vrot.slane %v411_v43, 4  ;;  %v1136_v46 = vadd.f32 %v816_v44, %v255_v36  ;;  %v381_v47 = vpop.f32.mrb[3].mxu0 }
  0xf7   : > { %v420_v48 = vmax.f32 %v418_v40, %v419_v42  ;;  %v1138_v50 = vadd.f32 %v381_v47, %v250_v33 }
  0xf8   : > { %v413_v53 = vmax.f32 %v411_v43, %v412_v45  ;;  %v432_v54 = vsel %vm410_vm2, %v1136_v46, -inf }
  0xf9   : > { %v421_v55 = vrot.slane %v420_v48, 2  ;;  %v433_v56 = vrot.slane %v432_v54, 4  ;;  %v425_v57 = vsel %vm410_vm2, %v1138_v50, -inf  ;;  %v819_v58 = vpop.f32.mrb[4].mxu0 }
  0xfa   : > { %v414_v59 = vrot.slane %v413_v53, 2  ;;  %v426_v60 = vrot.slane %v425_v57, 4  ;;  %v1144_v61 = vadd.f32 %v819_v58, %v265_v49  ;;  %v391_v62 = vpop.f32.mrb[5].mxu0 }
  0xfb   : > { %v422_v63 = vmax.f32 %v420_v48, %v421_v55  ;;  %v434_v0 = vmax.f32 %v432_v54, %v433_v56  ;;  %v1146_v1 = vadd.f32 %v391_v62, %v260_v51 }
  0xfc   : > { %v415_v3 = vmax.f32 %v413_v53, %v414_v59  ;;  %v427_v4 = vmax.f32 %v425_v57, %v426_v60  ;;  %v446_v5 = vsel %vm410_vm2, %v1144_v61, -inf }
  0xfd   : > { %v423_v6 = vrot.slane %v422_v63, 1  ;;  %v435_v7 = vrot.slane %v434_v0, 2  ;;  %v447_v8 = vrot.slane %v446_v5, 4  ;;  %v439_v10 = vsel %vm410_vm2, %v1146_v1, -inf  ;;  %v822_v11 = vpop.f32.mrb[6].mxu0 }
  0xfe   : > { %v416_v13 = vrot.slane %v415_v3, 1  ;;  %v428_v14 = vrot.slane %v427_v4, 2  ;;  %v440_v15 = vrot.slane %v439_v10, 4  ;;  %v1154_v16 = vadd.f32 %v822_v11, %v275_v9  ;;  %v401_v17 = vpop.f32.mrb[7].mxu0 }
  0xff   : > { %v424_v18 = vmax.f32 %v422_v63, %v423_v6  ;;  %v436_v19 = vmax.f32 %v434_v0, %v435_v7  ;;  %v448_v20 = vmax.f32 %v446_v5, %v447_v8  ;;  %v1156_v21 = vadd.f32 %v401_v17, %v270_v12 }
 0x100   : > { %v417_v22 = vmax.f32 %v415_v3, %v416_v13  ;;  %v429_v23 = vmax.f32 %v427_v4, %v428_v14  ;;  %v441_v25 = vmax.f32 %v439_v10, %v440_v15  ;;  %v460_v26 = vsel %vm410_vm2, %v1154_v16, -inf }
 0x101   : > { %vm471_vm3 = vcmp.eq.f32.partialorder %v377_v37, %v424_v18  ;;  %v437_v27 = vrot.slane %v436_v19, 1  ;;  %v449_v28 = vrot.slane %v448_v20, 2  ;;  %v461_v29 = vrot.slane %v460_v26, 4 }
 0x102   : > { %v479_v30 = vsel %vm471_vm3, %v1148_v2, 8.0  ;;  %vm470_vm4 = vcmp.eq.f32.partialorder %v372_v39, %v417_v22  ;;  %v430_v31 = vrot.slane %v429_v23, 1  ;;  %v442_v32 = vrot.slane %v441_v25, 2 }
 0x103   : > { %v493_v33 = vsel %vm410_vm2, %v479_v30, inf  ;;  %v478_v34 = vsel %vm470_vm4, %v1148_v2, 8.0  ;;  %v438_v35 = vmax.f32 %v436_v19, %v437_v27  ;;  %v450_v36 = vmax.f32 %v448_v20, %v449_v28 }
 0x104   : > { %v494_v38 = vrot.slane %v493_v33, 4  ;;  %v486_v40 = vsel %vm410_vm2, %v478_v34, inf  ;;  %v431_v41 = vmax.f32 %v429_v23, %v430_v31  ;;  %v443_v42 = vmax.f32 %v441_v25, %v442_v32 }
 0x105   : > { %v487_v37 = vrot.slane %v486_v40, 4  ;;  %vm473_vm5 = vcmp.eq.f32.partialorder %v1136_v46, %v438_v35  ;;  %v451_v43 = vrot.slane %v450_v36, 1  ;;  %v462_v44 = vmax.f32 %v460_v26, %v461_v29 }
 0x106   : > { %v495_v45 = vmin.f32 %v493_v33, %v494_v38  ;;  %v481_v39 = vsel %vm473_vm5, %v1148_v2, 8.0  ;;  %vm472_vm6 = vcmp.eq.f32.partialorder %v1138_v50, %v431_v41  ;;  %v444_v47 = vrot.slane %v443_v42, 1 }
 0x107   : > { %v488_v48 = vmin.f32 %v486_v40, %v487_v37  ;;  %v507_v49 = vsel %vm410_vm2, %v481_v39, inf  ;;  %v480_v51 = vsel %vm472_vm6, %v1148_v2, 8.0  ;;  %v452_v52 = vmax.f32 %v450_v36, %v451_v43 }
 0x108   : > { %v496_v53 = vrot.slane %v495_v45, 2  ;;  %v508_v54 = vrot.slane %v507_v49, 4  ;;  %v500_v55 = vsel %vm410_vm2, %v480_v51, inf  ;;  %v445_v56 = vmax.f32 %v443_v42, %v444_v47 }
 0x109   : > { %v489_v46 = vrot.slane %v488_v48, 2  ;;  %v501_v57 = vrot.slane %v500_v55, 4  ;;  %vm475_vm7 = vcmp.eq.f32.partialorder %v1144_v61, %v452_v52  ;;  %v463_v58 = vrot.slane %v462_v44, 2 }
 0x10a   : > { %v497_v59 = vmin.f32 %v495_v45, %v496_v53  ;;  %v509_v60 = vmin.f32 %v507_v49, %v508_v54  ;;  %v483_v50 = vsel %vm475_vm7, %v1148_v2, 8.0  ;;  %vm474_vm8 = vcmp.eq.f32.partialorder %v1146_v1, %v445_v56 }
 0x10b   : > { %v502_v62 = vmin.f32 %v500_v55, %v501_v57  ;;  %v521_v63 = vsel %vm410_vm2, %v483_v50, inf  ;;  %v482_v0 = vsel %vm474_vm8, %v1148_v2, 8.0  ;;  %v464_v3 = vmax.f32 %v462_v44, %v463_v58 }
 0x10c   : > { %v510_v4 = vrot.slane %v509_v60, 2  ;;  %v522_v5 = vrot.slane %v521_v63, 4  ;;  %v514_v6 = vsel %vm410_vm2, %v482_v0, inf  ;;  %v453_v61 = vsel %vm410_vm2, %v1156_v21, -inf  ;;  %v785_v0 = vld [vmem:[%s1254_s4] ss:$0 sm:$0xff] }
 0x10d   : > { %v503_v7 = vrot.slane %v502_v62, 2  ;;  %v515_v8 = vrot.slane %v514_v6, 4  ;;  %v465_v9 = vrot.slane %v464_v3, 1  ;;  %v454_v10 = vrot.slane %v453_v61, 4 }
 0x10e   : > { %v490_v11 = vmin.f32 %v488_v48, %v489_v46  ;;  %v498_v12 = vrot.slane %v497_v59, 1  ;;  %v511_v17 = vmin.f32 %v509_v60, %v510_v4  ;;  %v523_v19 = vmin.f32 %v521_v63, %v522_v5 }
 0x10f   : > { %v504_v1 = vmin.f32 %v502_v62, %v503_v7  ;;  %v516_v13 = vmin.f32 %v514_v6, %v515_v8  ;;  %v466_v14 = vmax.f32 %v464_v3, %v465_v9  ;;  %v455_v15 = vmax.f32 %v453_v61, %v454_v10 }
 0x110   : > { %v491_v18 = vrot.slane %v490_v11, 1  ;;  %v499_v22 = vmin.f32 %v497_v59, %v498_v12  ;;  %v524_v30 = vrot.slane %v523_v19, 2  ;;  %v512_v33 = vrot.slane %v511_v17, 1 }
 0x111   : > { %vm477_vm9 = vcmp.eq.f32.partialorder %v1154_v16, %v466_v14  ;;  %v456_v20 = vrot.slane %v455_v15, 2  ;;  %v517_v23 = vrot.slane %v516_v13, 2  ;;  %v505_v27 = vrot.slane %v504_v1, 1 }
 0x112   : > { %v485_v25 = vsel %vm477_vm9, %v1148_v2, 8.0  ;;  %v492_v26 = vmin.f32 %v490_v11, %v491_v18  ;;  %vm543_vm11 = vcmp.eq.f32.partialorder %v1148_v2, %v499_v22  ;;  %v525_v38 = vmin.f32 %v523_v19, %v524_v30 }
 0x113   : > { %v535_v28 = vsel %vm410_vm2, %v485_v25, inf  ;;  %v457_v29 = vmax.f32 %v455_v15, %v456_v20  ;;  %v518_v34 = vmin.f32 %v516_v13, %v517_v23  ;;  %v506_v16 = vmin.f32 %v504_v1, %v505_v27 }
 0x114   : > { %vm542_vm10 = vcmp.eq.f32.partialorder %v1148_v2, %v492_v26  ;;  %v536_v35 = vrot.slane %v535_v28, 4  ;;  %v778_v40 = vsel %vm543_vm11, 1.0, %v966_v24  ;;  %v513_v41 = vmin.f32 %v511_v17, %v512_v33 }
 0x115   : > { %v458_v31 = vrot.slane %v457_v29, 1  ;;  %v777_v32 = vsel %vm542_vm10, 1.0, %v966_v24  ;;  %vm544_vm13 = vcmp.eq.f32.partialorder %v1148_v2, %v506_v16  ;;  %v519_v43 = vrot.slane %v518_v34, 1 }
 0x116   : > { %581 = vxpose.xlu0.b32.start [1/8] (short) (narrow) %v777_v32, 8  ;;  %v537_v42 = vmin.f32 %v535_v28, %v536_v35  ;;  %v779_v39 = vsel %vm544_vm13, 1.0, %v966_v24  ;;  %v526_v47 = vrot.slane %v525_v38, 1  ;;  %vm545_vm14 = vcmp.eq.f32.partialorder %v1148_v2, %v513_v41 }
 0x117   : > { %v459_v36 = vmax.f32 %v457_v29, %v458_v31  ;;  %v780_v52 = vsel %vm545_vm14, 1.0, %v966_v24  ;;  %vm613_vm3 = vcmask 523264   ;;  %vm687_vm4 = vcmask 326656  }
 0x118   : > { %v538_v48 = vrot.slane %v537_v42, 2  ;;  %v527_v55 = vmin.f32 %v525_v38, %v526_v47 }
 0x119   : > { %vm476_vm12 = vcmp.eq.f32.partialorder %v1156_v21, %v459_v36  ;;  %v520_v21 = vmin.f32 %v518_v34, %v519_v43 }
 0x11a   : > { %v484_v37 = vsel %vm476_vm12, %v1148_v2, 8.0  ;;  %582 = vxpose.xlu0.b32.cont [2/8] (short) (narrow) %v778_v40, 8  ;;  %v539_v53 = vmin.f32 %v537_v42, %v538_v48  ;;  %vm547_vm0 = vcmp.eq.f32.partialorder %v1148_v2, %v527_v55 }
 0x11b   : > { %v528_v44 = vsel %vm410_vm2, %v484_v37, inf  ;;  %vm546_vm15 = vcmp.eq.f32.partialorder %v1148_v2, %v520_v21  ;;  %v782_v59 = vsel %vm547_vm0, 1.0, %v966_v24 }
 0x11c   : > { %v529_v45 = vrot.slane %v528_v44, 4  ;;  %v781_v46 = vsel %vm546_vm15, 1.0, %v966_v24  ;;  %v540_v58 = vrot.slane %v539_v53, 1 }
 0x11e   : > { %v530_v49 = vmin.f32 %v528_v44, %v529_v45  ;;  %583 = vxpose.xlu0.b32.cont [3/8] (short) (narrow) %v779_v39, 8  ;;  %v541_v60 = vmin.f32 %v539_v53, %v540_v58 }
 0x120   : > { %v531_v51 = vrot.slane %v530_v49, 2  ;;  %vm549_vm2 = vcmp.eq.f32.partialorder %v1148_v2, %v541_v60 }
 0x121   : > { %v784_v62 = vsel %vm549_vm2, 1.0, %v966_v24 }
 0x122   : > { %v532_v54 = vmin.f32 %v530_v49, %v531_v51  ;;  %584 = vxpose.xlu0.b32.cont [4/8] (short) (narrow) %v780_v52, 8 }
 0x124   : > { %v533_v56 = vrot.slane %v532_v54, 1 }
 0x126   : > { %585 = vxpose.xlu0.b32.cont [5/8] (short) (narrow) %v781_v46, 8  ;;  %v534_v57 = vmin.f32 %v532_v54, %v533_v56 }
 0x128   : > { %vm548_vm1 = vcmp.eq.f32.partialorder %v1148_v2, %v534_v57 }
 0x129   : > { %v783_v50 = vsel %vm548_vm1, 1.0, %v966_v24 }
 0x12a   : > { %586 = vxpose.xlu0.b32.cont [6/8] (short) (narrow) %v782_v59, 8 }
 0x12e   : > { %587 = vxpose.xlu0.b32.cont [7/8] (short) (narrow) %v783_v50, 8 }
 0x132   : > { %588 = vxpose.xlu0.b32.end [8/8] (short) (narrow) %v784_v62, 8 }
 0x196   : > { %v597_v63 = vpop.trf.xlu0 }
 0x197   : > { %840 = vmatmul.mubr.msk.f32.vlgmr.msra.gmra.mrb[0].mxu1 %vm613_vm3, %v597_v63 }
 0x26a   : > { %v683_v3 = vpop.f32.mrb[0].mxu1 }
 0x26b   : > { %v684_v4 = vadd.f32 %v785_v0, %v683_v3  ;;  %v841_v2 = vpop.f32.mrb[1].mxu1 }
 0x26d   : > { %688 = vst.msk [vmem:[%s215_s15] sm:$0xff] %vm687_vm4, %v684_v4 }
 0x26e   : > { %912 = shalt.err (!%p909_p3)
}
 0x26f   : > { %s913_s8 = scalar_lea.hbm %s1208_s25, 128  ;;  %s917_s11 = scalar_lea.hbm %s1255_s5, 256 }
 0x270   : > { %p914_p4 = scmp.ne.s32.totalorder %s1208_s25, %s913_s8  ;;  %p918_p9 = scmp.lt.u32.totalorder %s1208_s25, %s1255_s5 }
 0x271   : > { %p919_p10 = scmp.lt.u32.totalorder %s917_s11, %s913_s8  ;;  %p921_p12 = scmp.lt.u32.totalorder %s913_s8, %s1208_s25 }
 0x272   : > { %p915_p7 = pnand %p914_p4, %p1036_p5 }
 0x273   : > { %p920_p11 = por %p919_p10, %p918_p9 }
 0x274   : > { %p916_p8 = pneg %p915_p7 }
 0x275   : > { %p922_p13 = por %p921_p12, %p920_p11 }
 0x277   : > { %p923_p0 = pnand %p922_p13, %p916_p8 }
 0x279   : > { %926 = shalt.err (!%p923_p0)
}
 0x27a   : > { %854 = dma.vmem_to_hbm [thread:$0]  (%p1036_p5), %s1210_s16, 128, %s1208_s25, %s690_s26  }
 0x27b PF: > { %p860_p1 = scmp.ge.s32.totalorder %s961_s21, 2  ;;  %s715_s14 = sand.u32 1, %s949_s18  }
 0x27c   : > { %s716_s15 = scalar_lea.sflag [#allocation3], %s715_s14 }
 0x27d   : > { %p857_p2 = pnand %p860_p1, %p1040_p6 }
 0x27f   : > { %944 = dma.done.wait (!%p857_p2), %s716_s15, 128  }
 0x280   : > { %946 = vsyncadd (!%p857_p2), %s716_s15, 4294967168  ;;  %p15_p3 = scmp.ge.s32.totalorder %s1023_s24, 4   ;;  %s1258_s18 = smov %s953_s19 }
 0x281   : > { %s1259_s19 = smov %s957_s20  ;;  %s1260_s20 = smov %s1034_s27 }
 0x282   : > { %s1261_s21 = smov %s1023_s24  ;;  %17 = sbr.rel (!%p15_p3) target bundleno = 3 (0x3), region = 75 }
 0x289   :  { %721 = vsyncpa [#allocation3], 1 }
 0x28a   :  { %723 = vsyncpa [#allocation3 + $0x1], 1 }

</bundles_post_ra>
